<compile_context>
chip_gen: v6e
topology: v6e:2x2x1
jax: 0.10.0
libtpu: 0.0.40
codegen_flags: <defaults>
</compile_context>

<pallas_src>
import functools
import re

import jax
import jax.numpy as jnp
from jax.experimental import pallas as pl
from jax.experimental.pallas import tpu as pltpu

LANE = 128
SUBLANE = 8


def _round_up(n, m):
    return ((n + m - 1) // m) * m


@functools.lru_cache(maxsize=1)
def _tpu_generation():
    """Best-effort TPU generation from device_kind (0 if unknown)."""
    try:
        kind = jax.devices()[0].device_kind.lower()
    except Exception:
        return 0
    m = re.search(r"(\d+)", kind)
    return int(m.group(1)) if m else 0


def _vmem_capacity_bytes(gen):
    try:
        return int(pltpu.get_tpu_info().vmem_capacity_bytes)
    except Exception:
        # v7x: 64 MiB per TensorCore; v5e/v6e: 128 MiB.
        return (64 << 20) if gen >= 7 else (128 << 20)


# --------------------------------------------------------------------------------------
# Kernel
# --------------------------------------------------------------------------------------
def dqn_kernel(x_ref,
               w1_ref, b1_ref,
               w2_ref, b2_ref,
               w3_ref, b3_ref,
               w4_ref, b4_ref,
               o_ref):
    a = o_ref.shape[-1]                       # real action_size (un-padded output block)

    w2 = w2_ref[...]; w3 = w3_ref[...]; w4 = w4_ref[...]
    b2 = b2_ref[...]; b3 = b3_ref[...]
    wd = w2.dtype                             # MXU compute dtype (bf16 default / f32 exact)
    act = b2.dtype                            # VALU activation dtype (bf16 on v6e/v7x, else f32)

    # Layer 1 on the MXU (contraction depth padded to 8): f32 in, f32 accumulate,
    # bias-add + ReLU in f32, then a single cast into the activation dtype.
    h = jnp.dot(x_ref[...], w1_ref[...], preferred_element_type=jnp.float32)
    h = jnp.maximum(h + b1_ref[...], 0.0).astype(act)

    # Layers 2-3: MXU matmuls; bias-add + ReLU stay in the activation dtype
    # (halves VALU work on chips with a bf16 VPU; on v5e act == f32 so this is
    # exactly the old f32 path with per-layer casts).
    h = jnp.maximum(jnp.dot(h.astype(wd), w2, preferred_element_type=act) + b2, 0.0)
    h = jnp.maximum(jnp.dot(h.astype(wd), w3, preferred_element_type=act) + b3, 0.0)

    # Layer 4 (action head): f32 accumulate + f32 bias. Only the real action columns
    # are stored, so the HBM writeback is (TB, A) instead of the 128-padded slab.
    out = jnp.dot(h.astype(wd), w4, preferred_element_type=jnp.float32) + b4_ref[...]
    o_ref[...] = out[:, :a].astype(o_ref.dtype)


# --------------------------------------------------------------------------------------
# One-time parameter preparation (hoisted out of the per-call forward)
# --------------------------------------------------------------------------------------
def prepare_params(params, *, compute_dtype=jnp.bfloat16):
    """Pad + cast weights once.

    - w1 rows zero-padded so layer 1's contraction depth is sublane-aligned (8).
    - w4/b4 lanes zero-padded to 128 so the action head weight is lane-dense in VMEM.
    - w2..w4 cast to the MXU compute dtype; b2/b3 cast to the VALU activation dtype
      (bf16 only on chips with a bf16 VPU, i.e. gen >= 6); b1/b4 stay f32.
    """
    gen = _tpu_generation()
    cd = jnp.dtype(compute_dtype)
    act_dtype = cd if (cd == jnp.dtype(jnp.bfloat16) and gen >= 6) else jnp.dtype(jnp.float32)

    S, H = params["w1"].shape
    A = params["w4"].shape[1]
    S_pad = _round_up(S, SUBLANE)
    A_pad = _round_up(A, LANE)

    w1 = jnp.pad(params["w1"].astype(jnp.float32), ((0, S_pad - S), (0, 0)))
    b1 = params["b1"].astype(jnp.float32).reshape(1, H)
    w2 = params["w2"].astype(cd)
    b2 = params["b2"].astype(act_dtype).reshape(1, H)
    w3 = params["w3"].astype(cd)
    b3 = params["b3"].astype(act_dtype).reshape(1, H)
    w4 = jnp.pad(params["w4"].astype(cd), ((0, 0), (0, A_pad - A)))
    b4 = jnp.pad(params["b4"].astype(jnp.float32).reshape(1, A), ((0, 0), (0, A_pad - A)))
    return {"w1": w1, "b1": b1, "w2": w2, "b2": b2, "w3": w3, "b3": b3, "w4": w4, "b4": b4}


# --------------------------------------------------------------------------------------
# Forward wrapper
# --------------------------------------------------------------------------------------
def dqn_forward(x, p, *, action_size, tile_b=2048):
    """x: (B, state_size) f32; p: output of prepare_params(). Returns (B, action_size) f32."""
    B, S = x.shape
    S_pad, H = p["w1"].shape
    A_pad = p["w4"].shape[1]
    A = action_size

    gen = _tpu_generation()
    num_tc = 2 if gen >= 7 else 1            # v7x: 2 TensorCores behind one device

    # Pad the state dim to the sublane-aligned contraction depth baked into w1.
    if S_pad != S:
        x = jnp.pad(x, ((0, 0), (0, S_pad - S)))

    # Batch tile: as large as possible (amortizes ~0.35us/grid-step), but split into
    # at least num_tc tiles so both v7x TensorCores get work.
    tile_b = max(int(tile_b), SUBLANE)
    TB = _round_up(min(tile_b, _round_up(B, SUBLANE)), SUBLANE)
    if num_tc > 1:
        TB = min(TB, _round_up(pl.cdiv(B, num_tc), SUBLANE))
    B_pad = _round_up(B, TB)
    if B_pad != B:
        x = jnp.pad(x, ((0, B_pad - B), (0, 0)))
    num_tiles = B_pad // TB

    weights = (p["w1"], p["b1"], p["w2"], p["b2"], p["w3"], p["b3"], p["w4"], p["b4"])
    weight_bytes = sum(int(a.size) * a.dtype.itemsize for a in weights)

    def resident(arr):
        # Same block every grid step -> stays VMEM-resident across the batch loop.
        nd = arr.ndim
        return pl.BlockSpec(arr.shape, lambda i, _nd=nd: (0,) * _nd)

    in_specs = [pl.BlockSpec((TB, S_pad), lambda i: (i, 0))] + [resident(a) for a in weights]
    out_spec = pl.BlockSpec((TB, A), lambda i: (i, 0))       # un-padded HBM writeback

    # Generation-aware scoped-VMEM limit: above the 16/32 MiB scoped defaults, but
    # capped at ~75% of physical capacity (so <=48 MiB on a 64 MiB v7x TensorCore).
    est_bytes = (2 * TB * S_pad * 4          # double-buffered x tiles
                 + 2 * TB * A * 4            # double-buffered out tiles
                 + 4 * TB * H * 4            # live intermediates (f32-equivalent bound)
                 + weight_bytes)
    vmem_cap = _vmem_capacity_bytes(gen)
    vmem_limit = int(min(max(2 * est_bytes, 32 << 20), (3 * vmem_cap) // 4))

    cost = pl.CostEstimate(
        flops=2 * B_pad * H * (S_pad + 2 * H + A_pad),
        transcendentals=0,
        bytes_accessed=B_pad * S_pad * 4 + B_pad * A * 4 + weight_bytes)

    out = pl.pallas_call(
        dqn_kernel,
        out_shape=jax.ShapeDtypeStruct((B_pad, A), jnp.float32),
        grid=(num_tiles,),
        in_specs=in_specs,
        out_specs=out_spec,
        compiler_params=pltpu.CompilerParams(
            dimension_semantics=("parallel",),
            vmem_limit_bytes=vmem_limit),
        cost_estimate=cost,
    )(x, *weights)

    return out[:B]


# --------------------------------------------------------------------------------------
# Reference + init (matches PyTorch nn.Linear semantics: y = x @ W^T + b, stored as (in,out))
# --------------------------------------------------------------------------------------
def init_params(key, state_size=2, action_size=4, hidden_size=128):
    dims = [(state_size, hidden_size),
            (hidden_size, hidden_size),
            (hidden_size, hidden_size),
            (hidden_size, action_size)]
    params = {}
    for i, (fan_in, fan_out) in enumerate(dims, start=1):
        key, kw, kb = jax.random.split(key, 3)
        bound = 1.0 / jnp.sqrt(jnp.float32(fan_in))
        params[f"w{i}"] = jax.random.uniform(
            kw, (fan_in, fan_out), jnp.float32, minval=-bound, maxval=bound)
        params[f"b{i}"] = jax.random.uniform(
            kb, (1, fan_out), jnp.float32, minval=-bound, maxval=bound)
    return params


def dqn_reference(x, params):
    h = jnp.maximum(x @ params["w1"] + params["b1"], 0.0)
    h = jnp.maximum(h @ params["w2"] + params["b2"], 0.0)
    h = jnp.maximum(h @ params["w3"] + params["b3"], 0.0)
    return h @ params["w4"] + params["b4"]


if __name__ == "__main__":
    key = jax.random.PRNGKey(0)
    key, kx, kx2 = jax.random.split(key, 3)

    state_size, action_size, hidden_size = 2, 4, 128
    batch = 8

    params = init_params(key, state_size, action_size, hidden_size)
    x = jax.random.uniform(kx, (batch, state_size), jnp.float32)
    ref = dqn_reference(x, params)

    forward = jax.jit(dqn_forward, static_argnames=("action_size", "tile_b"))

    # 1) f32 compute path: matches the reference closely.
    p_f32 = prepare_params(params, compute_dtype=jnp.float32)
    out_f32 = jax.block_until_ready(forward(x, p_f32, action_size=action_size))
    assert out_f32.shape == (batch, action_size)
    assert jnp.allclose(out_f32, ref, atol=1e-4, rtol=1e-4), "f32 path mismatch vs reference"

    # 2) Default bf16 MXU path (bf16 activations on v6e/v7x, f32 VALU on v5e).
    p_bf16 = prepare_params(params)  # compute_dtype=bf16
    out_bf16 = jax.block_until_ready(forward(x, p_bf16, action_size=action_size))
    assert jnp.allclose(out_bf16, ref, atol=5e-2, rtol=5e-2), "bf16 path mismatch vs reference"

    # 3) Batch-tiled grid (non-multiple batch, multiple grid steps, resident weights).
    xl = jax.random.uniform(kx2, (300, state_size), jnp.float32)
    out_l = jax.block_until_ready(
        forward(xl, p_f32, action_size=action_size, tile_b=128))
    assert out_l.shape == (300, action_size)
    assert jnp.allclose(out_l, dqn_reference(xl, params), atol=1e-4, rtol=1e-4), \
        "tiled-grid path mismatch vs reference"

    print("KERNEL_OK")
</pallas_src>

<mosaic_0001>
module attributes {stable_mosaic.version = 11 : i64} {
  func.func @dqn_kernel(%arg0: i32, %arg1: memref<8x8xf32, #tpu.memory_space<vmem>>, %arg2: memref<8x128xf32, #tpu.memory_space<vmem>>, %arg3: memref<1x128xf32, #tpu.memory_space<vmem>>, %arg4: memref<128x128xf32, #tpu.memory_space<vmem>>, %arg5: memref<1x128xf32, #tpu.memory_space<vmem>>, %arg6: memref<128x128xf32, #tpu.memory_space<vmem>>, %arg7: memref<1x128xf32, #tpu.memory_space<vmem>>, %arg8: memref<128x128xf32, #tpu.memory_space<vmem>>, %arg9: memref<1x128xf32, #tpu.memory_space<vmem>>, %arg10: memref<8x4xf32, #tpu.memory_space<vmem>>) attributes {dimension_semantics = [#tpu.dimension_semantics<parallel>], iteration_bounds = array<i64: 1>, scalar_prefetch = 0 : i64, scratch_operands = 0 : i64, tpu.core_type = #tpu.core_type<tc>, window_params = [{transform_indices = @transform_0, window_bounds = array<i64: 8, 8>}, {pipeline_mode = #tpu.pipeline_mode<synchronous>, transform_indices = @transform_1, window_bounds = array<i64: 8, 128>}, {pipeline_mode = #tpu.pipeline_mode<synchronous>, transform_indices = @transform_2, window_bounds = array<i64: 1, 128>}, {pipeline_mode = #tpu.pipeline_mode<synchronous>, transform_indices = @transform_3, window_bounds = array<i64: 128, 128>}, {pipeline_mode = #tpu.pipeline_mode<synchronous>, transform_indices = @transform_4, window_bounds = array<i64: 1, 128>}, {pipeline_mode = #tpu.pipeline_mode<synchronous>, transform_indices = @transform_5, window_bounds = array<i64: 128, 128>}, {pipeline_mode = #tpu.pipeline_mode<synchronous>, transform_indices = @transform_6, window_bounds = array<i64: 1, 128>}, {pipeline_mode = #tpu.pipeline_mode<synchronous>, transform_indices = @transform_7, window_bounds = array<i64: 128, 128>}, {pipeline_mode = #tpu.pipeline_mode<synchronous>, transform_indices = @transform_8, window_bounds = array<i64: 1, 128>}, {transform_indices = @transform_9, window_bounds = array<i64: 8, 4>}]} {
    %c0 = arith.constant 0 : index
    %c0_0 = arith.constant 0 : index
    %0 = vector.load %arg4[%c0, %c0_0] : memref<128x128xf32, #tpu.memory_space<vmem>>, vector<128x128xf32>
    %c0_1 = arith.constant 0 : index
    %c0_2 = arith.constant 0 : index
    %1 = vector.load %arg6[%c0_1, %c0_2] : memref<128x128xf32, #tpu.memory_space<vmem>>, vector<128x128xf32>
    %c0_3 = arith.constant 0 : index
    %c0_4 = arith.constant 0 : index
    %2 = vector.load %arg8[%c0_3, %c0_4] : memref<128x128xf32, #tpu.memory_space<vmem>>, vector<128x128xf32>
    %c0_5 = arith.constant 0 : index
    %c0_6 = arith.constant 0 : index
    %3 = vector.load %arg5[%c0_5, %c0_6] : memref<1x128xf32, #tpu.memory_space<vmem>>, vector<1x128xf32>
    %c0_7 = arith.constant 0 : index
    %c0_8 = arith.constant 0 : index
    %4 = vector.load %arg7[%c0_7, %c0_8] : memref<1x128xf32, #tpu.memory_space<vmem>>, vector<1x128xf32>
    %c0_9 = arith.constant 0 : index
    %c0_10 = arith.constant 0 : index
    %5 = vector.load %arg1[%c0_9, %c0_10] : memref<8x8xf32, #tpu.memory_space<vmem>>, vector<8x8xf32>
    %c0_11 = arith.constant 0 : index
    %c0_12 = arith.constant 0 : index
    %6 = vector.load %arg2[%c0_11, %c0_12] : memref<8x128xf32, #tpu.memory_space<vmem>>, vector<8x128xf32>
    %cst = arith.constant dense<0.000000e+00> : vector<8x128xf32>
    %7 = tpu.matmul %5, %6, %cst {dimension_numbers = #tpu.dot_dimension_numbers<[1], [0], [0], [1], [0, 0, 1, 1], [], []>} : vector<8x8xf32>, vector<8x128xf32>, vector<8x128xf32> -> vector<8x128xf32>
    %c0_13 = arith.constant 0 : index
    %c0_14 = arith.constant 0 : index
    %8 = vector.load %arg3[%c0_13, %c0_14] : memref<1x128xf32, #tpu.memory_space<vmem>>, vector<1x128xf32>
    %9 = vector.broadcast %8 : vector<1x128xf32> to vector<8x128xf32>
    %10 = arith.addf %7, %9 : vector<8x128xf32>
    %cst_15 = arith.constant 0.000000e+00 : f32
    %11 = vector.broadcast %cst_15 : f32 to vector<8x128xf32>
    %12 = arith.maximumf %10, %11 : vector<8x128xf32>
    %cst_16 = arith.constant dense<0.000000e+00> : vector<8x128xf32>
    %13 = tpu.matmul %12, %0, %cst_16 {dimension_numbers = #tpu.dot_dimension_numbers<[1], [0], [0], [1], [0, 0, 1, 1], [], []>} : vector<8x128xf32>, vector<128x128xf32>, vector<8x128xf32> -> vector<8x128xf32>
    %14 = vector.broadcast %3 : vector<1x128xf32> to vector<8x128xf32>
    %15 = arith.addf %13, %14 : vector<8x128xf32>
    %cst_17 = arith.constant 0.000000e+00 : f32
    %16 = vector.broadcast %cst_17 : f32 to vector<8x128xf32>
    %17 = arith.maximumf %15, %16 : vector<8x128xf32>
    %cst_18 = arith.constant dense<0.000000e+00> : vector<8x128xf32>
    %18 = tpu.matmul %17, %1, %cst_18 {dimension_numbers = #tpu.dot_dimension_numbers<[1], [0], [0], [1], [0, 0, 1, 1], [], []>} : vector<8x128xf32>, vector<128x128xf32>, vector<8x128xf32> -> vector<8x128xf32>
    %19 = vector.broadcast %4 : vector<1x128xf32> to vector<8x128xf32>
    %20 = arith.addf %18, %19 : vector<8x128xf32>
    %cst_19 = arith.constant 0.000000e+00 : f32
    %21 = vector.broadcast %cst_19 : f32 to vector<8x128xf32>
    %22 = arith.maximumf %20, %21 : vector<8x128xf32>
    %cst_20 = arith.constant dense<0.000000e+00> : vector<8x128xf32>
    %23 = tpu.matmul %22, %2, %cst_20 {dimension_numbers = #tpu.dot_dimension_numbers<[1], [0], [0], [1], [0, 0, 1, 1], [], []>} : vector<8x128xf32>, vector<128x128xf32>, vector<8x128xf32> -> vector<8x128xf32>
    %c0_21 = arith.constant 0 : index
    %c0_22 = arith.constant 0 : index
    %24 = vector.load %arg9[%c0_21, %c0_22] : memref<1x128xf32, #tpu.memory_space<vmem>>, vector<1x128xf32>
    %25 = vector.broadcast %24 : vector<1x128xf32> to vector<8x128xf32>
    %26 = arith.addf %23, %25 : vector<8x128xf32>
    %27 = vector.extract_strided_slice %26 {offsets = [0, 0], sizes = [8, 4], strides = [1, 1]} : vector<8x128xf32> to vector<8x4xf32>
    %c0_23 = arith.constant 0 : index
    %c0_24 = arith.constant 0 : index
    %28 = vector.load %arg10[%c0_23, %c0_24] : memref<8x4xf32, #tpu.memory_space<vmem>>, vector<8x4xf32>
    tpu.vector_store %arg10[%c0_23, %c0_24], %27 {strides = array<i32>} : memref<8x4xf32, #tpu.memory_space<vmem>>, vector<8x4xf32>,
    return
  }
  func.func @transform_0(%arg0: i32) -> (i32, i32) {
    %c0_i32 = arith.constant 0 : i32
    %c0_i32_0 = arith.constant 0 : i32
    return %arg0, %c0_i32 : i32, i32
  }
  func.func @transform_1(%arg0: i32) -> (i32, i32) {
    %c0_i32 = arith.constant 0 : i32
    %c0_i32_0 = arith.constant 0 : i32
    %c0_i32_1 = arith.constant 0 : i32
    return %c0_i32, %c0_i32_0 : i32, i32
  }
  func.func @transform_2(%arg0: i32) -> (i32, i32) {
    %c0_i32 = arith.constant 0 : i32
    %c0_i32_0 = arith.constant 0 : i32
    %c0_i32_1 = arith.constant 0 : i32
    return %c0_i32, %c0_i32_0 : i32, i32
  }
  func.func @transform_3(%arg0: i32) -> (i32, i32) {
    %c0_i32 = arith.constant 0 : i32
    %c0_i32_0 = arith.constant 0 : i32
    %c0_i32_1 = arith.constant 0 : i32
    return %c0_i32, %c0_i32_0 : i32, i32
  }
  func.func @transform_4(%arg0: i32) -> (i32, i32) {
    %c0_i32 = arith.constant 0 : i32
    %c0_i32_0 = arith.constant 0 : i32
    %c0_i32_1 = arith.constant 0 : i32
    return %c0_i32, %c0_i32_0 : i32, i32
  }
  func.func @transform_5(%arg0: i32) -> (i32, i32) {
    %c0_i32 = arith.constant 0 : i32
    %c0_i32_0 = arith.constant 0 : i32
    %c0_i32_1 = arith.constant 0 : i32
    return %c0_i32, %c0_i32_0 : i32, i32
  }
  func.func @transform_6(%arg0: i32) -> (i32, i32) {
    %c0_i32 = arith.constant 0 : i32
    %c0_i32_0 = arith.constant 0 : i32
    %c0_i32_1 = arith.constant 0 : i32
    return %c0_i32, %c0_i32_0 : i32, i32
  }
  func.func @transform_7(%arg0: i32) -> (i32, i32) {
    %c0_i32 = arith.constant 0 : i32
    %c0_i32_0 = arith.constant 0 : i32
    %c0_i32_1 = arith.constant 0 : i32
    return %c0_i32, %c0_i32_0 : i32, i32
  }
  func.func @transform_8(%arg0: i32) -> (i32, i32) {
    %c0_i32 = arith.constant 0 : i32
    %c0_i32_0 = arith.constant 0 : i32
    %c0_i32_1 = arith.constant 0 : i32
    return %c0_i32, %c0_i32_0 : i32, i32
  }
  func.func @transform_9(%arg0: i32) -> (i32, i32) {
    %c0_i32 = arith.constant 0 : i32
    %c0_i32_0 = arith.constant 0 : i32
    return %arg0, %c0_i32 : i32, i32
  }
}

</mosaic_0001>

<bundles_post_ra>
// kernel: dqn_forward.1
= control target key start
LH: loop header
LB: loop body
LE: loop exit
PB: predicated region body
PF: predicated region fallthrough
CT: control target
= control target key end

     0   :  { %14 = vsyncpa [#allocation3], 0  ;;  %s829_s0 = inlined_call_operand.vmem [shape: f32[8,8], index: 0, kind: input, shape index: {}]   ;;  %s830_s1 = inlined_call_operand.vmem [shape: f32[8,128], index: 1, kind: input, shape index: {}]   ;;  %s831_s2 = inlined_call_operand.vmem [shape: f32[1,128], index: 2, kind: input, shape index: {}]   ;;  %s832_s3 = inlined_call_operand.hbm [shape: f32[128,128], index: 3, kind: input, shape index: {}]   ;;  %s833_s4 = inlined_call_operand.vmem [shape: f32[1,128], index: 4, kind: input, shape index: {}]   ;;  %s834_s5 = inlined_call_operand.hbm [shape: f32[128,128], index: 5, kind: input, shape index: {}]   ;;  %s835_s6 = inlined_call_operand.vmem [shape: f32[1,128], index: 6, kind: input, shape index: {}]   ;;  %s836_s7 = inlined_call_operand.hbm [shape: f32[128,128], index: 7, kind: input, shape index: {}]   ;;  %s837_s8 = inlined_call_operand.vmem [shape: f32[1,128], index: 8, kind: input, shape index: {}]   ;;  %s838_s9 = inlined_call_operand.vmem [shape: f32[8,4], index: 9, kind: output, shape index: {}]  }
   0x1   :  { %15 = vsyncpa [#allocation5], 0  ;;  %s685_s30 = smov [#allocation4]   ;;  %s686_s11 = smov [#allocation2]  }
   0x2   :  { %s41_s10 = sshll.u32 %s685_s30, 4  ;;  %s27_s12 = sshll.u32 %s686_s11, 4  ;;  %s42_s10 = int_to_ptr.vmem [resolvable:$true] %s41_s10  ;;  %s28_s12 = int_to_ptr.vmem [resolvable:$true] %s27_s12 }
   0x3   :  { %s629_s13 = scalar_lea.vmem %s42_s10, 2048  ;;  %p634_p1 = scmp.lt.s32.totalorder %s42_s10, %s42_s10 }
   0x4   :  { %p630_p0 = scmp.ne.s32.totalorder %s42_s10, %s629_s13  ;;  %p635_p2 = scmp.lt.s32.totalorder %s629_s13, %s629_s13 }
   0x6   :  { %p636_p3 = por %p635_p2, %p634_p1 }
   0x8   :  { %p637_p4 = pnand %p636_p3, %p630_p0 }
   0xa   :  { %640 = shalt.err (!%p637_p4)
}
   0xb   :  { %s687_s14 = smov 128   ;;  %s688_s15 = smov 8  }
   0xc   :  { %47 = dma.hbm_to_vmem [thread:$0]  %s834_s5, 2048, %s42_s10, [#allocation5], %s687_s14, %s687_s14, %s688_s15  }
   0xd   :  { %s649_s18 = scalar_lea.vmem %s28_s12, 2048  ;;  %p654_p6 = scmp.lt.s32.totalorder %s28_s12, %s28_s12 }
   0xe   :  { %p650_p5 = scmp.ne.s32.totalorder %s28_s12, %s649_s18  ;;  %p655_p7 = scmp.lt.s32.totalorder %s649_s18, %s649_s18 }
  0x10   :  { %p656_p8 = por %p655_p7, %p654_p6 }
  0x12   :  { %p657_p9 = pnand %p656_p8, %p650_p5 }
  0x14   :  { %660 = shalt.err (!%p657_p9)
}
  0x15   :  { %33 = dma.hbm_to_vmem [thread:$0]  %s832_s3, 2048, %s28_s12, [#allocation3], %s687_s14, %s687_s14, %s688_s15  }
  0x16   :  { %s689_s21 = smov [#allocation6]  }
  0x17   :  { %s55_s22 = sshll.u32 %s689_s21, 4  ;;  %s56_s22 = int_to_ptr.vmem [resolvable:$true] %s55_s22 }
  0x18   :  { %s669_s23 = scalar_lea.vmem %s56_s22, 2048  ;;  %p674_p11 = scmp.lt.s32.totalorder %s56_s22, %s56_s22 }
  0x19   :  { %p670_p10 = scmp.ne.s32.totalorder %s56_s22, %s669_s23  ;;  %p675_p12 = scmp.lt.s32.totalorder %s669_s23, %s669_s23 }
  0x1b   :  { %p676_p13 = por %p675_p12, %p674_p11 }
  0x1d   :  { %p677_p0 = pnand %p676_p13, %p670_p10 }
  0x1f   :  { %680 = shalt.err (!%p677_p0)
}
  0x20   :  { %61 = dma.hbm_to_vmem [thread:$0]  %s836_s7, 2048, %s56_s22, [#allocation5], %s687_s14, %s687_s14, %s688_s15  }
  0x21   :  { %681 = dma.done.wait [#allocation3], 2048  }
  0x22   :  { %682 = vsyncadd [#allocation3], 4294965248 }
  0x23   :  { %683 = dma.done.wait [#allocation5], 4096  }
  0x24   :  { %684 = vsyncadd [#allocation5], 4294963200  ;;  %v690_v0 = vmov 0.0   ;;  %vm691_vm0 = vmmov 0   ;;  %vm132_vm1 = vcmask 64512   ;;  %v124_v1 = vld [vmem:[%s830_s1] sm:$0xff] }
  0x25   :  { %504 = vmatprep.subr.mxu0 %v690_v0  ;;  %506 = vmatprep.mubr.msk.f32.mxu0 %vm691_vm0, %v690_v0  ;;  %v123_v2 = vld [vmem:[%s829_s0] sm:$0xff]  ;;  %v88_v3 = vld [vmem:[#allocation2 + $0x78] sm:$0xff]  ;;  %v87_v4 = vld [vmem:[#allocation2 + $0x70] sm:$0xff]  ;;  %vm438_vm2 = vcmask 31744  }
  0x26   :  { %509 = vmatprep.subr.mxu1 %v690_v0  ;;  %541 = vmatprep.mubr.msk.f32.mxu1 %vm691_vm0, %v690_v0  ;;  %v86_v5 = vld [vmem:[#allocation2 + $0x68] sm:$0xff]  ;;  %v85_v6 = vld [vmem:[#allocation2 + $0x60] sm:$0xff]  ;;  %v84_v7 = vld [vmem:[#allocation2 + $0x58] sm:$0xff] }
  0x27   :  { %505 = vmatpush3.msra.mxu0 %v124_v1  ;;  %510 = vmatpush3.msra.mxu1 %v88_v3  ;;  %v83_v8 = vld [vmem:[#allocation2 + $0x50] sm:$0xff]  ;;  %v82_v9 = vld [vmem:[#allocation2 + $0x48] sm:$0xff]  ;;  %v81_v10 = vld [vmem:[#allocation2 + $0x40] sm:$0xff] }
  0x28   :  { %507 = vmatmul.mubr.msk.f32.vlgmr.msra.gmra.mxu0 %vm132_vm1, %v123_v2  ;;  %511 = vmatprep.subr.mxu1 %v690_v0  ;;  %v80_v11 = vld [vmem:[#allocation2 + $0x38] sm:$0xff]  ;;  %v79_v12 = vld [vmem:[#allocation2 + $0x30] sm:$0xff]  ;;  %v78_v13 = vld [vmem:[#allocation2 + $0x28] sm:$0xff] }
  0x29   :  { %512 = vmatpush3.msra.mxu1 %v87_v4  ;;  %544 = vmatprep.subr.mxu0 %v690_v0  ;;  %v77_v14 = vld [vmem:[#allocation2 + $0x20] sm:$0xff]  ;;  %v76_v15 = vld [vmem:[#allocation2 + $0x18] sm:$0xff]  ;;  %v75_v16 = vld [vmem:[#allocation2 + $0x10] sm:$0xff] }
  0x2a   :  { %513 = vmatprep.subr.mxu1 %v690_v0  ;;  %576 = vmatprep.mubr.msk.f32.mxu0 %vm691_vm0, %v690_v0  ;;  %v74_v17 = vld [vmem:[#allocation2 + $0x8] sm:$0xff]  ;;  %v73_v18 = vld [vmem:[#allocation2] sm:$0xff]  ;;  %v104_v19 = vld [vmem:[#allocation4 + $0x78] sm:$0xff] }
  0x2b   :  { %514 = vmatpush3.msra.mxu1 %v86_v5  ;;  %v103_v20 = vld [vmem:[#allocation4 + $0x70] sm:$0xff]  ;;  %545 = vmatpush3.msra.mxu0 %v104_v19  ;;  %v102_v21 = vld [vmem:[#allocation4 + $0x68] sm:$0xff]  ;;  %v101_v22 = vld [vmem:[#allocation4 + $0x60] sm:$0xff] }
  0x2c   :  { %515 = vmatprep.subr.mxu1 %v690_v0  ;;  %546 = vmatprep.subr.mxu0 %v690_v0  ;;  %v100_v23 = vld [vmem:[#allocation4 + $0x58] sm:$0xff]  ;;  %v99_v24 = vld [vmem:[#allocation4 + $0x50] sm:$0xff]  ;;  %v98_v25 = vld [vmem:[#allocation4 + $0x48] sm:$0xff] }
  0x2d   :  { %516 = vmatpush3.msra.mxu1 %v85_v6  ;;  %547 = vmatpush3.msra.mxu0 %v103_v20  ;;  %v97_v26 = vld [vmem:[#allocation4 + $0x40] sm:$0xff]  ;;  %v96_v27 = vld [vmem:[#allocation4 + $0x38] sm:$0xff]  ;;  %v95_v28 = vld [vmem:[#allocation4 + $0x30] sm:$0xff] }
  0x2e   :  { %517 = vmatprep.subr.mxu1 %v690_v0  ;;  %548 = vmatprep.subr.mxu0 %v690_v0  ;;  %v94_v29 = vld [vmem:[#allocation4 + $0x28] sm:$0xff]  ;;  %v93_v30 = vld [vmem:[#allocation4 + $0x20] sm:$0xff]  ;;  %v92_v31 = vld [vmem:[#allocation4 + $0x18] sm:$0xff] }
  0x2f   :  { %518 = vmatpush3.msra.mxu1 %v84_v7  ;;  %549 = vmatpush3.msra.mxu0 %v102_v21  ;;  %v446_v32 = vld [vmem:[%s831_s2] ss:$0 sm:$0xff]  ;;  %v91_v37 = vld [vmem:[#allocation4 + $0x10] sm:$0xff]  ;;  %v90_v38 = vld [vmem:[#allocation4 + $0x8] sm:$0xff] }
  0x30   :  { %519 = vmatprep.subr.mxu1 %v690_v0  ;;  %550 = vmatprep.subr.mxu0 %v690_v0  ;;  %v89_v39 = vld [vmem:[#allocation4] sm:$0xff]  ;;  %v120_v40 = vld [vmem:[#allocation6 + $0x78] sm:$0xff]  ;;  %v119_v41 = vld [vmem:[#allocation6 + $0x70] sm:$0xff] }
  0x31   :  { %520 = vmatpush3.msra.mxu1 %v83_v8  ;;  %551 = vmatpush3.msra.mxu0 %v101_v22  ;;  %v118_v42 = vld [vmem:[#allocation6 + $0x68] sm:$0xff]  ;;  %v117_v43 = vld [vmem:[#allocation6 + $0x60] sm:$0xff]  ;;  %v116_v44 = vld [vmem:[#allocation6 + $0x58] sm:$0xff] }
  0x32   :  { %521 = vmatprep.subr.mxu1 %v690_v0  ;;  %552 = vmatprep.subr.mxu0 %v690_v0  ;;  %v115_v45 = vld [vmem:[#allocation6 + $0x50] sm:$0xff]  ;;  %v114_v46 = vld [vmem:[#allocation6 + $0x48] sm:$0xff]  ;;  %v113_v47 = vld [vmem:[#allocation6 + $0x40] sm:$0xff] }
  0x33   :  { %522 = vmatpush3.msra.mxu1 %v82_v9  ;;  %553 = vmatpush3.msra.mxu0 %v100_v23  ;;  %v112_v48 = vld [vmem:[#allocation6 + $0x38] sm:$0xff]  ;;  %v111_v49 = vld [vmem:[#allocation6 + $0x30] sm:$0xff]  ;;  %v110_v50 = vld [vmem:[#allocation6 + $0x28] sm:$0xff] }
  0x34   :  { %523 = vmatprep.subr.mxu1 %v690_v0  ;;  %554 = vmatprep.subr.mxu0 %v690_v0  ;;  %v109_v51 = vld [vmem:[#allocation6 + $0x20] sm:$0xff]  ;;  %v108_v52 = vld [vmem:[#allocation6 + $0x18] sm:$0xff]  ;;  %v107_v58 = vld [vmem:[#allocation6 + $0x10] sm:$0xff] }
  0x35   :  { %524 = vmatpush3.msra.mxu1 %v81_v10  ;;  %555 = vmatpush3.msra.mxu0 %v99_v24  ;;  %v448_v53 = vld [vmem:[%s833_s4] ss:$0 sm:$0xff]  ;;  %v106_v59 = vld [vmem:[#allocation6 + $0x8] sm:$0xff] }
  0x36   :  { %525 = vmatprep.subr.mxu1 %v690_v0  ;;  %556 = vmatprep.subr.mxu0 %v690_v0  ;;  %v105_v60 = vld [vmem:[#allocation6] sm:$0xff] }
  0x37   :  { %526 = vmatpush3.msra.mxu1 %v80_v11  ;;  %557 = vmatpush3.msra.mxu0 %v98_v25  ;;  %v449_v61 = vld [vmem:[%s835_s6] ss:$0 sm:$0xff] }
  0x38   :  { %527 = vmatprep.subr.mxu1 %v690_v0  ;;  %558 = vmatprep.subr.mxu0 %v690_v0  ;;  %v450_v3 = vld [vmem:[%s837_s8] ss:$0 sm:$0xff] }
  0x39   :  { %528 = vmatpush3.msra.mxu1 %v79_v12  ;;  %559 = vmatpush3.msra.mxu0 %v97_v26 }
  0x3a   :  { %529 = vmatprep.subr.mxu1 %v690_v0  ;;  %560 = vmatprep.subr.mxu0 %v690_v0 }
  0x3b   :  { %530 = vmatpush3.msra.mxu1 %v78_v13  ;;  %561 = vmatpush3.msra.mxu0 %v96_v27 }
  0x3c   :  { %531 = vmatprep.subr.mxu1 %v690_v0  ;;  %562 = vmatprep.subr.mxu0 %v690_v0 }
  0x3d   :  { %532 = vmatpush3.msra.mxu1 %v77_v14  ;;  %563 = vmatpush3.msra.mxu0 %v95_v28 }
  0x3e   :  { %533 = vmatprep.subr.mxu1 %v690_v0  ;;  %564 = vmatprep.subr.mxu0 %v690_v0 }
  0x3f   :  { %534 = vmatpush3.msra.mxu1 %v76_v15  ;;  %565 = vmatpush3.msra.mxu0 %v94_v29 }
  0x40   :  { %535 = vmatprep.subr.mxu1 %v690_v0  ;;  %566 = vmatprep.subr.mxu0 %v690_v0 }
  0x41   :  { %536 = vmatpush3.msra.mxu1 %v75_v16  ;;  %567 = vmatpush3.msra.mxu0 %v93_v30 }
  0x42   :  { %537 = vmatprep.subr.mxu1 %v690_v0  ;;  %568 = vmatprep.subr.mxu0 %v690_v0 }
  0x43   :  { %538 = vmatpush3.msra.mxu1 %v74_v17  ;;  %569 = vmatpush3.msra.mxu0 %v92_v31 }
  0x44   :  { %539 = vmatprep.subr.mxu1 %v690_v0  ;;  %570 = vmatprep.subr.mxu0 %v690_v0 }
  0x45   :  { %540 = vmatpush3.msra.mxu1 %v73_v18  ;;  %571 = vmatpush3.msra.mxu0 %v91_v37 }
  0x46   :  { %579 = vmatprep.subr.mxu1 %v690_v0  ;;  %572 = vmatprep.subr.mxu0 %v690_v0 }
  0x47   :  { %573 = vmatpush3.msra.mxu0 %v90_v38 }
  0x48   :  { %574 = vmatprep.subr.mxu0 %v690_v0 }
  0x49   :  { %575 = vmatpush3.msra.mxu0 %v89_v39 }
  0xe8   :  { %v202_v33 = vpop.f32.mrf.mxu0 }
  0xe9   :  { %v203_v34 = vadd.f32 %v446_v32, %v202_v33 }
  0xea   :  { %v508_v35 = vpop.f32.mrf.mxu0 }
  0xeb   :  { %v206_v36 = vmax.f32 %v203_v34, 0.0 }
  0xed   :  { %542 = vmatmul.mubr.f32.vlgmr.msra.gmra.mxu1 %v206_v36 }
  0xee   :  { %611 = vmatprep.mubr.msk.f32.mxu1 %vm691_vm0, %v690_v0  ;;  %580 = vmatpush3.msra.mxu1 %v120_v40 }
  0xef   :  { %581 = vmatprep.subr.mxu1 %v690_v0 }
  0xf0   :  { %582 = vmatpush3.msra.mxu1 %v119_v41 }
  0xf1   :  { %583 = vmatprep.subr.mxu1 %v690_v0 }
  0xf2   :  { %584 = vmatpush3.msra.mxu1 %v118_v42 }
  0xf3   :  { %585 = vmatprep.subr.mxu1 %v690_v0 }
  0xf4   :  { %586 = vmatpush3.msra.mxu1 %v117_v43 }
  0xf5   :  { %587 = vmatprep.subr.mxu1 %v690_v0 }
  0xf6   :  { %588 = vmatpush3.msra.mxu1 %v116_v44 }
  0xf7   :  { %589 = vmatprep.subr.mxu1 %v690_v0 }
  0xf8   :  { %590 = vmatpush3.msra.mxu1 %v115_v45 }
  0xf9   :  { %591 = vmatprep.subr.mxu1 %v690_v0 }
  0xfa   :  { %592 = vmatpush3.msra.mxu1 %v114_v46 }
  0xfb   :  { %593 = vmatprep.subr.mxu1 %v690_v0 }
  0xfc   :  { %594 = vmatpush3.msra.mxu1 %v113_v47 }
  0xfd   :  { %595 = vmatprep.subr.mxu1 %v690_v0 }
  0xfe   :  { %596 = vmatpush3.msra.mxu1 %v112_v48 }
  0xff   :  { %597 = vmatprep.subr.mxu1 %v690_v0 }
 0x100   :  { %598 = vmatpush3.msra.mxu1 %v111_v49 }
 0x101   :  { %599 = vmatprep.subr.mxu1 %v690_v0 }
 0x102   :  { %600 = vmatpush3.msra.mxu1 %v110_v50 }
 0x103   :  { %601 = vmatprep.subr.mxu1 %v690_v0 }
 0x104   :  { %602 = vmatpush3.msra.mxu1 %v109_v51 }
 0x105   :  { %603 = vmatprep.subr.mxu1 %v690_v0 }
 0x106   :  { %604 = vmatpush3.msra.mxu1 %v108_v52 }
 0x107   :  { %605 = vmatprep.subr.mxu1 %v690_v0 }
 0x108   :  { %606 = vmatpush3.msra.mxu1 %v107_v58 }
 0x109   :  { %607 = vmatprep.subr.mxu1 %v690_v0 }
 0x10a   :  { %608 = vmatpush3.msra.mxu1 %v106_v59 }
 0x10b   :  { %609 = vmatprep.subr.mxu1 %v690_v0 }
 0x10c   :  { %610 = vmatpush3.msra.mxu1 %v105_v60 }
 0x1ad   :  { %v279_v54 = vpop.f32.mrf.mxu1 }
 0x1ae   :  { %v280_v55 = vadd.f32 %v448_v53, %v279_v54 }
 0x1af   :  { %v543_v56 = vpop.f32.mrf.mxu1 }
 0x1b0   :  { %v283_v57 = vmax.f32 %v280_v55, 0.0 }
 0x1b2   :  { %577 = vmatmul.mubr.f32.vlgmr.msra.gmra.mxu0 %v283_v57 }
 0x272   :  { %v356_v62 = vpop.f32.mrf.mxu0 }
 0x273   :  { %v357_v63 = vadd.f32 %v449_v61, %v356_v62 }
 0x274   :  { %v578_v1 = vpop.f32.mrf.mxu0 }
 0x275   :  { %v360_v2 = vmax.f32 %v357_v63, 0.0 }
 0x277   :  { %612 = vmatmul.mubr.f32.vlgmr.msra.gmra.mxu1 %v360_v2 }
 0x337   :  { %v434_v4 = vpop.f32.mrf.mxu1 }
 0x338   :  { %v435_v5 = vadd.f32 %v450_v3, %v434_v4 }
 0x339   :  { %v613_v6 = vpop.f32.mrf.mxu1 }
 0x33a   :  { %439 = vst.msk [vmem:[%s838_s9] sm:$0xff] %vm438_vm2, %v435_v5 }
 0x33b   :  { %444 = vsyncpa [#allocation3], 1 }
 0x33c   :  { %445 = vsyncpa [#allocation5], 1 }

</bundles_post_ra>
